<compile_context>
chip_gen: v7x
topology: tpu7x:2x2x1
jax: 0.10.0
libtpu: 0.0.40
codegen_flags: <defaults>
</compile_context>

<pallas_src>
import jax
import jax.numpy as jnp
from jax.experimental import pallas as pl
from jax.experimental.pallas import tpu as pltpu


LANE = 128      # lane width: fc3 output columns padded to a multiple of this
SUBLANE = 8     # sublane width: batch tile must be a multiple of this
MAX_TB = 1024   # max batch tile (kernel is overhead/DMA-bound -> go big)


def _round_up(x, m):
    return ((x + m - 1) // m) * m


def _num_tensorcores_per_chip():
    """v7x has 2 TensorCores/chip; v5e/v6e have 1.  Best-effort detection."""
    try:
        kind = jax.devices()[0].device_kind.lower()
    except Exception:
        return 1
    return 2 if ("v7" in kind or "tpu7" in kind) else 1


def _mlp_kernel(x_ref, w1_ref, b1_ref, w2_ref, b2_ref, w3_ref, b3_ref, o_ref):
    x = x_ref[...]

    # fc1 + relu
    h = jnp.dot(x, w1_ref[...], preferred_element_type=jnp.float32) + b1_ref[...]
    h = jnp.maximum(h, 0.0)

    # fc2 + relu
    h = jnp.dot(h, w2_ref[...], preferred_element_type=jnp.float32) + b2_ref[...]
    h = jnp.maximum(h, 0.0)

    # fc3 (output columns padded to a lane-dense 128-wide slab)
    out = jnp.dot(h, w3_ref[...], preferred_element_type=jnp.float32) + b3_ref[...]
    o_ref[...] = out.astype(o_ref.dtype)


def _forward_padded_impl(state, w1, b1, w2, b2, w3p, b3p):
    """state: (B, state_size); w3p/b3p already lane-padded.  Returns (B', 128k)
    with B' = max(B, 8)."""
    batch, state_size = state.shape
    hidden1 = w1.shape[1]
    hidden2 = w2.shape[1]
    out_pad = w3p.shape[1]

    # Only truly tiny batches get padded (<= 7 extra rows); everything else
    # relies on Pallas' ragged-last-block masking -> no extra HBM round-trip.
    rows = batch
    if rows < SUBLANE:
        state = jnp.pad(state, ((0, SUBLANE - rows), (0, 0)))
        rows = SUBLANE

    # Batch tile: as large as possible, but on v7x keep the grid >= #cores so
    # the "parallel" axis actually spans both TensorCores.
    cores = _num_tensorcores_per_chip()
    target = pl.cdiv(rows, cores) if cores > 1 else rows
    tb = max(SUBLANE, min(MAX_TB, _round_up(target, SUBLANE)))
    grid = (pl.cdiv(rows, tb),)   # last block may be ragged; Pallas masks it

    # Advisory cost hint so XLA schedules the custom call sensibly.
    flops = 2 * rows * (state_size * hidden1 + hidden1 * hidden2 + hidden2 * out_pad)
    bytes_accessed = 4 * (
        rows * state_size                       # activations in
        + state_size * hidden1 + hidden1        # fc1
        + hidden1 * hidden2 + hidden2           # fc2
        + hidden2 * out_pad + out_pad           # fc3 (padded)
        + rows * out_pad                        # output slab
    )
    cost = pl.CostEstimate(flops=flops, transcendentals=0,
                           bytes_accessed=bytes_accessed)

    # Weights/biases: constant index_map -> VMEM-resident across all tiles.
    const = lambda i: (0, 0)
    in_specs = [
        pl.BlockSpec((tb, state_size), lambda i: (i, 0)),      # state tile
        pl.BlockSpec((state_size, hidden1), const),            # w1
        pl.BlockSpec((1, hidden1), const),                     # b1
        pl.BlockSpec((hidden1, hidden2), const),               # w2
        pl.BlockSpec((1, hidden2), const),                     # b2
        pl.BlockSpec((hidden2, out_pad), const),               # w3 (padded)
        pl.BlockSpec((1, out_pad), const),                     # b3 (padded)
    ]
    out_spec = pl.BlockSpec((tb, out_pad), lambda i: (i, 0))

    return pl.pallas_call(
        _mlp_kernel,
        out_shape=jax.ShapeDtypeStruct((rows, out_pad), jnp.float32),
        grid=grid,
        in_specs=in_specs,
        out_specs=out_spec,
        compiler_params=pltpu.CompilerParams(
            dimension_semantics=("parallel",),   # megacore sharding on v7x
        ),
        cost_estimate=cost,
    )(state, w1, b1, w2, b2, w3p, b3p)


@jax.jit
def network_forward_padded(state, w1, b1, w2, b2, w3, b3):
    """Returns the lane-dense (B, round_up(action_size, 128)) Q-value slab.
    Callers that can consume the padded slab avoid re-reading it from HBM."""
    batch = state.shape[0]
    action_size = w3.shape[1]
    out_pad = _round_up(action_size, LANE)
    if out_pad != action_size:
        w3 = jnp.pad(w3, ((0, 0), (0, out_pad - action_size)))
        b3 = jnp.pad(b3, ((0, 0), (0, out_pad - action_size)))
    out = _forward_padded_impl(state, w1, b1, w2, b2, w3, b3)
    return out[:batch]


@jax.jit
def network_forward(state, w1, b1, w2, b2, w3, b3):
    """state: (B, state_size) f32 -> (B, action_size) f32 (PyTorch semantics)."""
    action_size = w3.shape[1]
    return network_forward_padded(state, w1, b1, w2, b2, w3, b3)[:, :action_size]


def init_params(key, state_size, hidden1, hidden2, action_size):
    """PyTorch-style nn.Linear init: U(-1/sqrt(fan_in), 1/sqrt(fan_in))."""
    ks = jax.random.split(key, 6)

    def linear(kw, kb, fan_in, fan_out):
        bound = 1.0 / jnp.sqrt(jnp.asarray(fan_in, jnp.float32))
        # stored as (in, out): forward is x @ W + b
        w = jax.random.uniform(kw, (fan_in, fan_out), jnp.float32, -bound, bound)
        b = jax.random.uniform(kb, (1, fan_out), jnp.float32, -bound, bound)
        return w, b

    w1, b1 = linear(ks[0], ks[1], state_size, hidden1)
    w2, b2 = linear(ks[2], ks[3], hidden1, hidden2)
    w3, b3 = linear(ks[4], ks[5], hidden2, action_size)
    return w1, b1, w2, b2, w3, b3


def reference_forward(state, w1, b1, w2, b2, w3, b3):
    h = jnp.maximum(state @ w1 + b1, 0.0)
    h = jnp.maximum(h @ w2 + b2, 0.0)
    return h @ w3 + b3


if __name__ == "__main__":
    state_size = 8       # LunarLander-style small state
    hidden1 = hidden2 = 64
    action_size = 4

    key = jax.random.PRNGKey(0)
    k_params, k_a, k_b, k_c, k_d = jax.random.split(key, 5)
    params = init_params(k_params, state_size, hidden1, hidden2, action_size)

    def check(batch, k):
        s = jax.random.normal(k, (batch, state_size), jnp.float32)
        out = jax.block_until_ready(network_forward(s, *params))
        ref = reference_forward(s, *params)
        assert out.shape == (batch, action_size), out.shape
        assert jnp.allclose(out, ref, atol=1e-5, rtol=1e-5), \
            f"mismatch at batch={batch}"

    check(8, k_a)       # single small tile (inference-size)
    check(3, k_b)       # sub-sublane batch (tiny-pad path)
    check(500, k_c)     # ragged last block (no jnp.pad round-trip)
    check(2080, k_d)    # multi-tile grid + ragged tail (DQN batch-update size)

    # Padded-slab API (option (a) from the perf review): lane-dense output,
    # no slice read-back.
    s = jax.random.normal(k_a, (8, state_size), jnp.float32)
    slab = jax.block_until_ready(network_forward_padded(s, *params))
    assert slab.shape == (8, _round_up(action_size, LANE))
    assert jnp.allclose(slab[:, :action_size], reference_forward(s, *params),
                        atol=1e-5, rtol=1e-5)

    print("KERNEL_OK")
</pallas_src>

<mosaic_0001>
module attributes {stable_mosaic.version = 11 : i64} {
  func.func @_mlp_kernel(%arg0: i32, %arg1: memref<8x8xf32, #tpu.memory_space<vmem>>, %arg2: memref<8x64xf32, #tpu.memory_space<vmem>>, %arg3: memref<1x64xf32, #tpu.memory_space<vmem>>, %arg4: memref<64x64xf32, #tpu.memory_space<vmem>>, %arg5: memref<1x64xf32, #tpu.memory_space<vmem>>, %arg6: memref<64x128xf32, #tpu.memory_space<vmem>>, %arg7: memref<1x128xf32, #tpu.memory_space<vmem>>, %arg8: memref<8x128xf32, #tpu.memory_space<vmem>>) attributes {dimension_semantics = [#tpu.dimension_semantics<parallel>], iteration_bounds = array<i64: 1>, scalar_prefetch = 0 : i64, scratch_operands = 0 : i64, tpu.core_type = #tpu.core_type<tc>, window_params = [{transform_indices = @transform_0, window_bounds = array<i64: 8, 8>}, {pipeline_mode = #tpu.pipeline_mode<synchronous>, transform_indices = @transform_1, window_bounds = array<i64: 8, 64>}, {pipeline_mode = #tpu.pipeline_mode<synchronous>, transform_indices = @transform_2, window_bounds = array<i64: 1, 64>}, {pipeline_mode = #tpu.pipeline_mode<synchronous>, transform_indices = @transform_3, window_bounds = array<i64: 64, 64>}, {pipeline_mode = #tpu.pipeline_mode<synchronous>, transform_indices = @transform_4, window_bounds = array<i64: 1, 64>}, {pipeline_mode = #tpu.pipeline_mode<synchronous>, transform_indices = @transform_5, window_bounds = array<i64: 64, 128>}, {pipeline_mode = #tpu.pipeline_mode<synchronous>, transform_indices = @transform_6, window_bounds = array<i64: 1, 128>}, {transform_indices = @transform_7, window_bounds = array<i64: 8, 128>}]} {
    %c0 = arith.constant 0 : index
    %c0_0 = arith.constant 0 : index
    %0 = vector.load %arg1[%c0, %c0_0] : memref<8x8xf32, #tpu.memory_space<vmem>>, vector<8x8xf32>
    %c0_1 = arith.constant 0 : index
    %c0_2 = arith.constant 0 : index
    %1 = vector.load %arg2[%c0_1, %c0_2] : memref<8x64xf32, #tpu.memory_space<vmem>>, vector<8x64xf32>
    %cst = arith.constant dense<0.000000e+00> : vector<8x64xf32>
    %2 = tpu.matmul %0, %1, %cst {dimension_numbers = #tpu.dot_dimension_numbers<[1], [0], [0], [1], [0, 0, 1, 1], [], []>} : vector<8x8xf32>, vector<8x64xf32>, vector<8x64xf32> -> vector<8x64xf32>
    %c0_3 = arith.constant 0 : index
    %c0_4 = arith.constant 0 : index
    %3 = vector.load %arg3[%c0_3, %c0_4] : memref<1x64xf32, #tpu.memory_space<vmem>>, vector<1x64xf32>
    %4 = vector.broadcast %3 : vector<1x64xf32> to vector<8x64xf32>
    %5 = arith.addf %2, %4 : vector<8x64xf32>
    %cst_5 = arith.constant 0.000000e+00 : f32
    %6 = vector.broadcast %cst_5 : f32 to vector<8x64xf32>
    %7 = arith.maximumf %5, %6 : vector<8x64xf32>
    %c0_6 = arith.constant 0 : index
    %c0_7 = arith.constant 0 : index
    %8 = vector.load %arg4[%c0_6, %c0_7] : memref<64x64xf32, #tpu.memory_space<vmem>>, vector<64x64xf32>
    %cst_8 = arith.constant dense<0.000000e+00> : vector<8x64xf32>
    %9 = tpu.matmul %7, %8, %cst_8 {dimension_numbers = #tpu.dot_dimension_numbers<[1], [0], [0], [1], [0, 0, 1, 1], [], []>} : vector<8x64xf32>, vector<64x64xf32>, vector<8x64xf32> -> vector<8x64xf32>
    %c0_9 = arith.constant 0 : index
    %c0_10 = arith.constant 0 : index
    %10 = vector.load %arg5[%c0_9, %c0_10] : memref<1x64xf32, #tpu.memory_space<vmem>>, vector<1x64xf32>
    %11 = vector.broadcast %10 : vector<1x64xf32> to vector<8x64xf32>
    %12 = arith.addf %9, %11 : vector<8x64xf32>
    %cst_11 = arith.constant 0.000000e+00 : f32
    %13 = vector.broadcast %cst_11 : f32 to vector<8x64xf32>
    %14 = arith.maximumf %12, %13 : vector<8x64xf32>
    %c0_12 = arith.constant 0 : index
    %c0_13 = arith.constant 0 : index
    %15 = vector.load %arg6[%c0_12, %c0_13] : memref<64x128xf32, #tpu.memory_space<vmem>>, vector<64x128xf32>
    %cst_14 = arith.constant dense<0.000000e+00> : vector<8x128xf32>
    %16 = tpu.matmul %14, %15, %cst_14 {dimension_numbers = #tpu.dot_dimension_numbers<[1], [0], [0], [1], [0, 0, 1, 1], [], []>} : vector<8x64xf32>, vector<64x128xf32>, vector<8x128xf32> -> vector<8x128xf32>
    %c0_15 = arith.constant 0 : index
    %c0_16 = arith.constant 0 : index
    %17 = vector.load %arg7[%c0_15, %c0_16] : memref<1x128xf32, #tpu.memory_space<vmem>>, vector<1x128xf32>
    %18 = vector.broadcast %17 : vector<1x128xf32> to vector<8x128xf32>
    %19 = arith.addf %16, %18 : vector<8x128xf32>
    %c0_17 = arith.constant 0 : index
    %c0_18 = arith.constant 0 : index
    %20 = vector.load %arg8[%c0_17, %c0_18] : memref<8x128xf32, #tpu.memory_space<vmem>>, vector<8x128xf32>
    tpu.vector_store %arg8[%c0_17, %c0_18], %19 {strides = array<i32>} : memref<8x128xf32, #tpu.memory_space<vmem>>, vector<8x128xf32>,
    return
  }
  func.func @transform_0(%arg0: i32) -> (i32, i32) {
    %c0_i32 = arith.constant 0 : i32
    %c0_i32_0 = arith.constant 0 : i32
    return %arg0, %c0_i32 : i32, i32
  }
  func.func @transform_1(%arg0: i32) -> (i32, i32) {
    %c0_i32 = arith.constant 0 : i32
    %c0_i32_0 = arith.constant 0 : i32
    %c0_i32_1 = arith.constant 0 : i32
    return %c0_i32, %c0_i32_0 : i32, i32
  }
  func.func @transform_2(%arg0: i32) -> (i32, i32) {
    %c0_i32 = arith.constant 0 : i32
    %c0_i32_0 = arith.constant 0 : i32
    %c0_i32_1 = arith.constant 0 : i32
    return %c0_i32, %c0_i32_0 : i32, i32
  }
  func.func @transform_3(%arg0: i32) -> (i32, i32) {
    %c0_i32 = arith.constant 0 : i32
    %c0_i32_0 = arith.constant 0 : i32
    %c0_i32_1 = arith.constant 0 : i32
    return %c0_i32, %c0_i32_0 : i32, i32
  }
  func.func @transform_4(%arg0: i32) -> (i32, i32) {
    %c0_i32 = arith.constant 0 : i32
    %c0_i32_0 = arith.constant 0 : i32
    %c0_i32_1 = arith.constant 0 : i32
    return %c0_i32, %c0_i32_0 : i32, i32
  }
  func.func @transform_5(%arg0: i32) -> (i32, i32) {
    %c0_i32 = arith.constant 0 : i32
    %c0_i32_0 = arith.constant 0 : i32
    %c0_i32_1 = arith.constant 0 : i32
    return %c0_i32, %c0_i32_0 : i32, i32
  }
  func.func @transform_6(%arg0: i32) -> (i32, i32) {
    %c0_i32 = arith.constant 0 : i32
    %c0_i32_0 = arith.constant 0 : i32
    %c0_i32_1 = arith.constant 0 : i32
    return %c0_i32, %c0_i32_0 : i32, i32
  }
  func.func @transform_7(%arg0: i32) -> (i32, i32) {
    %c0_i32 = arith.constant 0 : i32
    %c0_i32_0 = arith.constant 0 : i32
    return %arg0, %c0_i32 : i32, i32
  }
}

</mosaic_0001>

<bundles_post_ra>
// kernel: network_forward_padded.1
= control target key start
LH: loop header
LB: loop body
LE: loop exit
PB: predicated region body
PF: predicated region fallthrough
CT: control target
= control target key end

     0   :  { %vm36_vm0 = vcmask 64512   ;;  %v425_v2 = vmov 0.0   ;;  %vm426_vm1 = vmmov 0   ;;  %v427_v6 = vmov 0.0|0.0   ;;  %s547_s0 = inlined_call_operand.vmem [shape: f32[8,8], index: 0, kind: input, shape index: {}]   ;;  %s548_s1 = inlined_call_operand.vmem [shape: f32[8,64], index: 1, kind: input, shape index: {}]   ;;  %s549_s2 = inlined_call_operand.vmem [shape: f32[1,64], index: 2, kind: input, shape index: {}]   ;;  %s550_s3 = inlined_call_operand.vmem [shape: f32[64,64], index: 3, kind: input, shape index: {}]   ;;  %s551_s4 = inlined_call_operand.vmem [shape: f32[1,64], index: 4, kind: input, shape index: {}]   ;;  %s552_s5 = inlined_call_operand.vmem [shape: f32[64,128], index: 5, kind: input, shape index: {}]   ;;  %s553_s6 = inlined_call_operand.vmem [shape: f32[1,128], index: 6, kind: input, shape index: {}]   ;;  %s554_s7 = inlined_call_operand.hbm [shape: f32[8,128], index: 7, kind: output, shape index: {}]  }
   0x1   :  { %v28_v0 = vld [vmem:[%s548_s1] sm:$0xff]  ;;  %330 = vmatprep.subr.mxu0 %v425_v2  ;;  %332 = vmatprep.mubr.msk.f32.mxu0 %vm426_vm1, %v425_v2  ;;  %v112_v4 = vld [vmem:[%s550_s3 + $0x8] sm:$0xff]  ;;  %v113_v5 = vld [vmem:[%s550_s3 + $0x10] sm:$0xff] }
   0x2   :  { %v27_v1 = vld [vmem:[%s547_s0] sm:$0xff]  ;;  %331 = vmatpush3.msra.mxu0 %v28_v0  ;;  %373 = vmatprep.subr.bf16.mxu1 %v427_v6  ;;  %v114_v8 = vld [vmem:[%s550_s3 + $0x18] sm:$0xff] }
   0x3   :  { %v111_v3 = vld [vmem:[%s550_s3] sm:$0xff]  ;;  %333 = vmatmul.mubr.msk.f32.vlgmr.msra.gmra.mrb[0].mxu0 %vm36_vm0, %v27_v1  ;;  %351 = vmatprep.mubr.msk.f32.mxu1 %vm426_vm1, %v425_v2 }
   0x4   :  { %v374_v7 = vpack.c.bf16 %v112_v4, %v111_v3 }
   0x5   :  { %12 = vsyncpa [#allocation3], 0  ;;  %v377_v9 = vpack.c.bf16 %v114_v8, %v113_v5  ;;  %385 = vmatprep.subr.bf16.mxu0 %v427_v6  ;;  %v115_v10 = vld [vmem:[%s550_s3 + $0x20] sm:$0xff]  ;;  %v116_v11 = vld [vmem:[%s550_s3 + $0x28] sm:$0xff]  ;;  %370 = vmatprep.mubr.msk.f32.mxu0 %vm426_vm1, %v425_v2  ;;  %vm126_vm2 = vcmask 523264   ;;  %s428_s14 = smov [#allocation2]  }
   0x6   :  { %375 = vmatpush3.bf16.msra.mxu1 %v374_v7  ;;  %v380_v12 = vpack.c.bf16 %v116_v11, %v115_v10  ;;  %v117_v13 = vld [vmem:[%s550_s3 + $0x30] sm:$0xff]  ;;  %v118_v14 = vld [vmem:[%s550_s3 + $0x38] sm:$0xff]  ;;  %v201_v16 = vld [vmem:[%s552_s5] sm:$0xff]  ;;  %s296_s15 = sshll.u32 %s428_s14, 4  ;;  %s297_s15 = int_to_ptr.vmem [resolvable:$true] %s296_s15 }
   0x7   :  { %376 = vmatprep.subr.bf16.mxu1 %v427_v6  ;;  %v383_v15 = vpack.c.bf16 %v118_v14, %v117_v13  ;;  %v202_v17 = vld [vmem:[%s552_s5 + $0x8] sm:$0xff]  ;;  %v203_v18 = vld [vmem:[%s552_s5 + $0x10] sm:$0xff]  ;;  %v204_v20 = vld [vmem:[%s552_s5 + $0x18] sm:$0xff]  ;;  %p406_p1 = scmp.lt.s32.totalorder %s297_s15, %s297_s15 }
   0x8   :  { %v386_v19 = vpack.c.bf16 %v202_v17, %v201_v16  ;;  %v389_v21 = vpack.c.bf16 %v204_v20, %v203_v18  ;;  %v205_v22 = vld [vmem:[%s552_s5 + $0x20] sm:$0xff]  ;;  %v206_v23 = vld [vmem:[%s552_s5 + $0x28] sm:$0xff]  ;;  %v207_v30 = vld [vmem:[%s552_s5 + $0x30] sm:$0xff] }
   0x9   :  { %v392_v24 = vpack.c.bf16 %v206_v23, %v205_v22  ;;  %v304_v25 = vld [vmem:[%s549_s2] ss:$0 sm:$0xff]  ;;  %v208_v31 = vld [vmem:[%s552_s5 + $0x38] sm:$0xff]  ;;  %s401_s5 = scalar_lea.vmem %s297_s15, 128 }
   0xa   :  { %378 = vmatpush3.bf16.msra.mxu1 %v377_v9  ;;  %387 = vmatpush3.bf16.msra.mxu0 %v386_v19  ;;  %v395_v32 = vpack.c.bf16 %v208_v31, %v207_v30  ;;  %v306_v33 = vld [vmem:[%s551_s4] ss:$0 sm:$0xff]  ;;  %p402_p0 = scmp.ne.s32.totalorder %s297_s15, %s401_s5  ;;  %p407_p2 = scmp.lt.s32.totalorder %s401_s5, %s401_s5 }
   0xb   :  { %379 = vmatprep.subr.bf16.mxu1 %v427_v6  ;;  %388 = vmatprep.subr.bf16.mxu0 %v427_v6  ;;  %v308_v38 = vld [vmem:[%s553_s6] ss:$0 sm:$0xff] }
   0xc   :  { %p408_p3 = por %p407_p2, %p406_p1 }
   0xe   :  { %381 = vmatpush3.bf16.msra.mxu1 %v380_v12  ;;  %390 = vmatpush3.bf16.msra.mxu0 %v389_v21  ;;  %p409_p4 = pnand %p408_p3, %p402_p0 }
   0xf   :  { %382 = vmatprep.subr.bf16.mxu1 %v427_v6  ;;  %391 = vmatprep.subr.bf16.mxu0 %v427_v6 }
  0x12   :  { %384 = vmatpush3.bf16.msra.mxu1 %v383_v15  ;;  %393 = vmatpush3.bf16.msra.mxu0 %v392_v24 }
  0x13   :  { %394 = vmatprep.subr.bf16.mxu0 %v427_v6 }
  0x16   :  { %396 = vmatpush3.bf16.msra.mxu0 %v395_v32 }
  0xd6   :  { %v106_v26 = vpop.f32.mrb[0].mxu0 }
  0xd7   :  { %v107_v27 = vadd.f32 %v304_v25, %v106_v26  ;;  %v334_v28 = vpop.f32.mrb[1].mxu0 }
  0xd9   :  { %v110_v29 = vmax.f32 %v107_v27, 0.0 }
  0xdb   :  { %352 = vmatmul.mubr.msk.f32.vlgmr.msra.gmra.mrb[0].mxu1 %vm126_vm2, %v110_v29 }
 0x1ae   :  { %v196_v34 = vpop.f32.mrb[0].mxu1 }
 0x1af   :  { %v197_v35 = vadd.f32 %v306_v33, %v196_v34  ;;  %v353_v36 = vpop.f32.mrb[1].mxu1 }
 0x1b1   :  { %v200_v37 = vmax.f32 %v197_v35, 0.0 }
 0x1b3   :  { %371 = vmatmul.mubr.msk.f32.vlgmr.msra.gmra.mrb[2].mxu0 %vm126_vm2, %v200_v37 }
 0x286   :  { %v285_v39 = vpop.f32.mrb[2].mxu0 }
 0x287   :  { %v286_v40 = vadd.f32 %v308_v38, %v285_v39  ;;  %v372_v41 = vpop.f32.mrb[3].mxu0 }
 0x289   :  { %289 = vst [vmem:[#allocation2] sm:$0xff] %v286_v40 }
 0x28a   :  { %412 = shalt.err (!%p409_p4)
}
 0x28b   :  { %s413_s17 = scalar_lea.hbm %s554_s7, 128 }
 0x28c   :  { %p414_p5 = scmp.ne.s32.totalorder %s554_s7, %s413_s17  ;;  %p417_p6 = scmp.lt.u32.totalorder %s413_s17, %s554_s7 }
 0x28e   :  { %p419_p7 = pnand %p417_p6, %p414_p5 }
 0x290   :  { %422 = shalt.err (!%p419_p7)
}
 0x291   :  { %299 = dma.vmem_to_hbm [thread:$0]  %s297_s15, 128, %s554_s7, [#allocation3]  }
 0x292   :  { %423 = dma.done.wait [#allocation3], 128  }
 0x293   :  { %424 = vsyncadd [#allocation3], 4294967168 }
 0x294   :  { %303 = vsyncpa [#allocation3], 1 }

</bundles_post_ra>
